<compile_context>
chip_gen: v7x
topology: tpu7x:2x2x1
jax: 0.10.0
libtpu: 0.0.40
codegen_flags: <defaults>
</compile_context>

<pallas_src>
import functools

import jax
import jax.numpy as jnp
from jax.experimental import pallas as pl
from jax.experimental.pallas import tpu as pltpu


def _compress_conv_kernel(x_ref, w_ref, b_ref, o_ref, *, bn, compute_dtype):
    # x_ref: (bn, Cin, thw) native dtype     w_ref: (Cout, Cin) compute dtype
    # b_ref: (Cout, 1) f32                   o_ref: (bn, Cout, thw) out dtype
    w = w_ref[...]
    b = b_ref[...]
    for i in range(bn):  # bn is small & static -> unrolled 2-D MXU dots, no transposes
        x = x_ref[i].astype(compute_dtype)   # in-kernel cast: no wrapper HBM pass
        acc = jnp.dot(w, x, preferred_element_type=jnp.float32)
        o_ref[i] = (acc + b).astype(o_ref.dtype)


def _largest_divisor_leq(n, cap):
    cap = max(1, min(int(cap), int(n)))
    for d in range(cap, 0, -1):
        if n % d == 0:
            return d
    return 1


def compress_conv(x_nchw, weight, bias, *, compute_dtype=jnp.bfloat16):
    """nn.Conv2d(in_channels, out_channels, kernel_size=1) forward.

    x_nchw : (N, Cin, H, W)
    weight : (Cout, Cin, 1, 1)   -- PyTorch conv weight layout
    bias   : (Cout,)
    Returns (N, Cout, H, W) in x_nchw.dtype.  Pass compute_dtype=jnp.float32
    for exact f32 parity with PyTorch (default: bf16 matmul, f32 accumulate).
    """
    N, Cin, H, W = x_nchw.shape
    Cout = weight.shape[0]
    P = H * W
    out_dtype = x_nchw.dtype
    compute_dtype = jnp.dtype(compute_dtype)

    x_itm = jnp.dtype(x_nchw.dtype).itemsize
    out_itm = jnp.dtype(out_dtype).itemsize
    w_itm = compute_dtype.itemsize

    # ---- per-generation VMEM budget --------------------------------------
    try:
        vmem_cap = int(pltpu.get_tpu_info().vmem_capacity_bytes)
    except Exception:
        vmem_cap = 64 * 1024 * 1024          # conservative fallback (v7x-sized)
    budget = min(int(0.35 * vmem_cap), 48 * 1024 * 1024)
    # Resident weight + bias (count 2 buffers each, to be safe).
    wb_bytes = 2 * Cout * Cin * w_itm + 2 * Cout * 4
    tile_budget = max(budget - wb_bytes, 2 * 1024 * 1024)

    # ---- tile selection ---------------------------------------------------
    # Spatial tile = t_units * 128 lanes; chosen as a divisor of the
    # 128-rounded H*W so no pad-to-tile / output slice is needed.  bn batch
    # elements share one grid step when a single spatial tile already covers
    # all of H*W (small images) to amortize per-grid-step overhead.
    p_rounded = ((P + 127) // 128) * 128
    p_units = p_rounded // 128
    bytes_per_unit = 128 * 2 * (Cin * x_itm + Cout * out_itm)   # dbl-buffered x+out
    max_units = max(1, tile_budget // bytes_per_unit)
    # TODO(synk): for very large Cin/Cout (tiles or resident W exceeding the
    # VMEM budget even at 128 lanes) add Cin-reduction / Cout grid axes.

    t_units = _largest_divisor_leq(p_units, max_units)
    n_hw = p_units // t_units
    bn = _largest_divisor_leq(N, max_units // t_units) if n_hw == 1 else 1

    # v7x megacore: keep >= 2 grid steps whenever possible so the second
    # TensorCore is not idle.
    if (N // bn) * n_hw == 1:
        if p_units >= 2:
            t_units = _largest_divisor_leq(p_units, min(max_units, p_units // 2))
            n_hw = p_units // t_units
        elif N >= 2:
            bn = _largest_divisor_leq(N, N // 2)

    thw = t_units * 128
    n_b = N // bn

    # ---- wrapper-side glue (all cheap / free) -----------------------------
    x3 = x_nchw.reshape(N, Cin, P)            # free reshape, no transpose
    if p_rounded != P:                        # only for ragged H*W
        x3 = jnp.pad(x3, ((0, 0), (0, 0), (0, p_rounded - P)))
    w_mat = weight.reshape(Cout, Cin).astype(compute_dtype)   # tiny
    b_col = bias.reshape(Cout, 1).astype(jnp.float32)         # tiny

    vmem_needed = (2 * bn * thw * (Cin * x_itm + Cout * out_itm)
                   + 2 * Cout * Cin * w_itm + 2 * Cout * 4)
    vmem_limit = int(min(max(2 * vmem_needed, 16 * 1024 * 1024),
                         int(0.85 * vmem_cap)))

    cost = pl.CostEstimate(
        flops=2 * N * p_rounded * Cin * Cout,
        transcendentals=0,
        bytes_accessed=(N * Cin * p_rounded * x_itm
                        + N * Cout * p_rounded * out_itm
                        + Cout * Cin * w_itm + Cout * 4),
    )

    kernel = functools.partial(_compress_conv_kernel, bn=bn,
                               compute_dtype=compute_dtype)

    out3 = pl.pallas_call(
        kernel,
        out_shape=jax.ShapeDtypeStruct((N, Cout, p_rounded), out_dtype),
        grid_spec=pltpu.PrefetchScalarGridSpec(
            num_scalar_prefetch=0,
            grid=(n_b, n_hw),
            in_specs=[
                # X tile (bn, Cin, thw): lane-dense loads, native dtype.
                pl.BlockSpec((bn, Cin, thw), lambda b, t: (b, 0, t)),
                # Full weight, constant block index (resident, reused).
                pl.BlockSpec((Cout, Cin), lambda b, t: (0, 0)),
                # Bias as a (Cout, 1) column, constant block index.
                pl.BlockSpec((Cout, 1), lambda b, t: (0, 0)),
            ],
            # Output tile (bn, Cout, thw): unmasked, lane-dense stores.
            out_specs=pl.BlockSpec((bn, Cout, thw), lambda b, t: (b, 0, t)),
        ),
        compiler_params=pltpu.CompilerParams(
            dimension_semantics=("parallel", "parallel"),
            vmem_limit_bytes=vmem_limit,
        ),
        cost_estimate=cost,
    )(x3, w_mat, b_col)

    if p_rounded != P:
        out3 = out3[:, :, :P]
    return out3.reshape(N, Cout, H, W)


if __name__ == "__main__":
    key = jax.random.PRNGKey(0)
    k_x, k_w, k_b = jax.random.split(key, 3)

    N, Cin, Cout, Hs, Ws = 2, 4, 8, 16, 16

    x = jax.random.normal(k_x, (N, Cin, Hs, Ws), dtype=jnp.float32)
    # deterministic synthetic parameters (shapes match nn.Conv2d(Cin, Cout, 1))
    weight = jax.random.normal(k_w, (Cout, Cin, 1, 1), dtype=jnp.float32) * 0.1
    bias = jax.random.normal(k_b, (Cout,), dtype=jnp.float32) * 0.1

    out = compress_conv(x, weight, bias)
    jax.block_until_ready(out)

    # reference check in plain JAX (same math as F.conv2d with 1x1 kernel).
    # bf16 matmul with f32 accumulation -> slightly relaxed tolerance.
    ref = jnp.einsum("nchw,oc->nohw", x, weight.reshape(Cout, Cin)) \
        + bias.reshape(1, Cout, 1, 1)
    assert out.shape == (N, Cout, Hs, Ws)
    assert jnp.allclose(out, ref, atol=1e-2, rtol=1e-2), "mismatch vs reference"

    print("KERNEL_OK")
</pallas_src>

<mosaic_0001>
module attributes {stable_mosaic.version = 11 : i64} {
  func.func @_compress_conv_kernel(%arg0: i32, %arg1: i32, %arg2: memref<2x4x128xf32, #tpu.memory_space<vmem>>, %arg3: memref<8x4xbf16, #tpu.memory_space<vmem>>, %arg4: memref<8x1xf32, #tpu.memory_space<vmem>>, %arg5: memref<2x8x128xf32, #tpu.memory_space<vmem>>) attributes {dimension_semantics = [#tpu.dimension_semantics<parallel>, #tpu.dimension_semantics<parallel>], iteration_bounds = array<i64: 1, 2>, scalar_prefetch = 0 : i64, scratch_operands = 0 : i64, tpu.core_type = #tpu.core_type<tc>, window_params = [{transform_indices = @transform_0, window_bounds = array<i64: 2, 4, 128>}, {pipeline_mode = #tpu.pipeline_mode<synchronous>, transform_indices = @transform_1, window_bounds = array<i64: 8, 4>}, {pipeline_mode = #tpu.pipeline_mode<synchronous>, transform_indices = @transform_2, window_bounds = array<i64: 8, 1>}, {transform_indices = @transform_3, window_bounds = array<i64: 2, 8, 128>}]} {
    %c0 = arith.constant 0 : index
    %c0_0 = arith.constant 0 : index
    %0 = vector.load %arg3[%c0, %c0_0] : memref<8x4xbf16, #tpu.memory_space<vmem>>, vector<8x4xbf16>
    %c0_1 = arith.constant 0 : index
    %c0_2 = arith.constant 0 : index
    %1 = vector.load %arg4[%c0_1, %c0_2] : memref<8x1xf32, #tpu.memory_space<vmem>>, vector<8x1xf32>
    %c0_3 = arith.constant 0 : index
    %c0_4 = arith.constant 0 : index
    %c0_5 = arith.constant 0 : index
    %2 = vector.load %arg2[%c0_3, %c0_4, %c0_5] : memref<2x4x128xf32, #tpu.memory_space<vmem>>, vector<1x4x128xf32>
    %3 = vector.shape_cast %2 : vector<1x4x128xf32> to vector<4x128xf32>
    %4 = arith.truncf %3 : vector<4x128xf32> to vector<4x128xbf16>
    %cst = arith.constant dense<0.000000e+00> : vector<8x128xf32>
    %5 = tpu.matmul %0, %4, %cst {dimension_numbers = #tpu.dot_dimension_numbers<[1], [0], [0], [1], [0, 0, 1, 1], [], []>} : vector<8x4xbf16>, vector<4x128xbf16>, vector<8x128xf32> -> vector<8x128xf32>
    %6 = vector.broadcast %1 : vector<8x1xf32> to vector<8x128xf32>
    %7 = arith.addf %5, %6 : vector<8x128xf32>
    %c0_6 = arith.constant 0 : index
    %c0_7 = arith.constant 0 : index
    %c0_8 = arith.constant 0 : index
    %8 = vector.load %arg5[%c0_6, %c0_7, %c0_8] : memref<2x8x128xf32, #tpu.memory_space<vmem>>, vector<1x8x128xf32>
    %9 = vector.shape_cast %8 : vector<1x8x128xf32> to vector<8x128xf32>
    %10 = vector.shape_cast %7 : vector<8x128xf32> to vector<1x8x128xf32>
    tpu.vector_store %arg5[%c0_6, %c0_7, %c0_8], %10 {strides = array<i32>} : memref<2x8x128xf32, #tpu.memory_space<vmem>>, vector<1x8x128xf32>,
    %c1 = arith.constant 1 : index
    %c0_9 = arith.constant 0 : index
    %c0_10 = arith.constant 0 : index
    %11 = vector.load %arg2[%c1, %c0_9, %c0_10] : memref<2x4x128xf32, #tpu.memory_space<vmem>>, vector<1x4x128xf32>
    %12 = vector.shape_cast %11 : vector<1x4x128xf32> to vector<4x128xf32>
    %13 = arith.truncf %12 : vector<4x128xf32> to vector<4x128xbf16>
    %cst_11 = arith.constant dense<0.000000e+00> : vector<8x128xf32>
    %14 = tpu.matmul %0, %13, %cst_11 {dimension_numbers = #tpu.dot_dimension_numbers<[1], [0], [0], [1], [0, 0, 1, 1], [], []>} : vector<8x4xbf16>, vector<4x128xbf16>, vector<8x128xf32> -> vector<8x128xf32>
    %15 = vector.broadcast %1 : vector<8x1xf32> to vector<8x128xf32>
    %16 = arith.addf %14, %15 : vector<8x128xf32>
    %c1_12 = arith.constant 1 : index
    %c0_13 = arith.constant 0 : index
    %c0_14 = arith.constant 0 : index
    %17 = vector.load %arg5[%c1_12, %c0_13, %c0_14] : memref<2x8x128xf32, #tpu.memory_space<vmem>>, vector<1x8x128xf32>
    %18 = vector.shape_cast %17 : vector<1x8x128xf32> to vector<8x128xf32>
    %19 = vector.shape_cast %16 : vector<8x128xf32> to vector<1x8x128xf32>
    tpu.vector_store %arg5[%c1_12, %c0_13, %c0_14], %19 {strides = array<i32>} : memref<2x8x128xf32, #tpu.memory_space<vmem>>, vector<1x8x128xf32>,
    return
  }
  func.func @transform_0(%arg0: i32, %arg1: i32) -> (i32, i32, i32) {
    %c0_i32 = arith.constant 0 : i32
    %c0_i32_0 = arith.constant 0 : i32
    return %arg0, %c0_i32, %arg1 : i32, i32, i32
  }
  func.func @transform_1(%arg0: i32, %arg1: i32) -> (i32, i32) {
    %c0_i32 = arith.constant 0 : i32
    %c0_i32_0 = arith.constant 0 : i32
    %c0_i32_1 = arith.constant 0 : i32
    return %c0_i32, %c0_i32_0 : i32, i32
  }
  func.func @transform_2(%arg0: i32, %arg1: i32) -> (i32, i32) {
    %c0_i32 = arith.constant 0 : i32
    %c0_i32_0 = arith.constant 0 : i32
    %c0_i32_1 = arith.constant 0 : i32
    return %c0_i32, %c0_i32_0 : i32, i32
  }
  func.func @transform_3(%arg0: i32, %arg1: i32) -> (i32, i32, i32) {
    %c0_i32 = arith.constant 0 : i32
    %c0_i32_0 = arith.constant 0 : i32
    return %arg0, %c0_i32, %arg1 : i32, i32, i32
  }
}

</mosaic_0001>

<bundles_post_ra>
// kernel: tpu_custom_call.1
= control target key start
LH: loop header
LB: loop body
LE: loop exit
PB: predicated region body
PF: predicated region fallthrough
CT: control target
= control target key end

     0   :  { %8 = vsyncpa [#allocation3], 0  ;;  %s847_s0 = inlined_call_operand.hbm [shape: f32[2,4,256], index: 0, kind: input, shape index: {}]   ;;  %s848_s1 = inlined_call_operand.vmem [shape: bf16[8,4], index: 1, kind: input, shape index: {}]   ;;  %s849_s2 = inlined_call_operand.vmem [shape: f32[8,1], index: 2, kind: input, shape index: {}]   ;;  %s850_s3 = inlined_call_operand.hbm [shape: f32[2,8,256], index: 3, kind: output, shape index: {}]  }
   0x1   :  { %10 = vsyncpa [#allocation3 + $0x1], 0 }
   0x2   :  { %11 = vsyncpa [#allocation4], 0 }
   0x3   :  { %13 = vsyncpa [#allocation4 + $0x1], 0  ;;  %s667_s12 = smov 0   ;;  %s669_s13 = smov 0  }
   0x4   :  { %s671_s14 = smov 0   ;;  %s673_s15 = smov 0  }
   0x5   :  { %s675_s16 = smov 0   ;;  %s677_s17 = smov 0  }
   0x6 LB: > { %s417_s18 = sadd.s32 4294967295, %s634_s17   ;;  %s418_s19 = sadd.s32 4294967294, %s634_s17   ;;  %s634_s17 = sphi %s677_s17, %s19_s17   ;;  %s630_s16 = sphi %s675_s16, %s864_s16   ;;  %s626_s15 = sphi %s673_s15, %s863_s15   ;;  %s622_s14 = sphi %s671_s14, %s862_s14   ;;  %s618_s13 = sphi %s669_s13, %s861_s13   ;;  %s614_s12 = sphi %s667_s12, %s860_s12  }
   0x7   : > { %s28_s20 = sadd.s32 1, %s630_s16  ;;  %s40_s21 = sadd.s32 1, %s622_s14 }
   0x8   : > { %p29_p0 = scmp.ge.s32.totalorder %s28_s20, 2  ;;  %p47_p1 = scmp.ne.s32.totalorder %s622_s14, %s618_s13 }
   0x9   : > { %p48_p2 = scmp.eq.s32.totalorder %s634_s17, 0  ;;  %p53_p3 = scmp.ne.s32.totalorder %s618_s13, %s614_s12 }
   0xa   : > { %s866_s20 = smov (%p29_p0, %s28_s20), 0  ;;  %p54_p5 = scmp.eq.s32.totalorder %s417_s18, 0 }
   0xb   : > { %p708_p4 = por %p48_p2, %p47_p1  ;;  %s36_s23 = ssub.s32 %s630_s16, %s866_s20 }
   0xc   : > { %p121_p6 = scmp.eq.s32.totalorder %s417_s18, 1  ;;  %p38_p7 = scmp.eq.s32.totalorder %s36_s23, 0 }
   0xd   : > { %p714_p8 = por %p54_p5, %p53_p3  ;;  %p127_p10 = scmp.eq.s32.totalorder %s418_s19, 1 }
   0xe   : > { %p718_p9 = por %p121_p6, %p47_p1  ;;  %p462_p13 = scmp.lt.s32.totalorder %s634_s17, 2 }
   0xf   : > { %s723_s26 = scalar_select %p38_p7, %s622_s14, %s40_s21  }
  0x10   : > { %s854_s25 = scalar_select %p718_p9, 1, 0 }
  0x11   : > { %p725_p11 = por %p127_p10, %p53_p3  ;;  %s153_s28 = sand.u32 1, %s622_s14  }
  0x12   : > { %s421_s29 = sshll.u32 %s153_s28, 3  ;;  %s422_s30 = sshll.u32 %s630_s16, 6 }
  0x13   : > { %s855_s27 = scalar_select %p725_p11, 1, 0 }
  0x14   : > { %s736_s6 = scalar_lea.hbm %s847_s0, %s422_s30  ;;  %s157_s7 = scalar_lea.vmem [#allocation2], %s421_s29 }
  0x15   : > { %s166_s8 = sshll.u32 %s157_s7, 4  ;;  %p742_p0 = pnand %p462_p13, %p708_p4  ;;  %s738_s8 = int_to_ptr.vmem [resolvable:$true] %s166_s8 }
  0x16   : > { %s746_s10 = scalar_lea.sflag [#allocation3], %s153_s28  ;;  %s522_s11 = scalar_lea.hbm %s736_s6, 128 }
  0x17   : > { %p523_p1 = scmp.ne.s32.totalorder %s736_s6, %s522_s11  ;;  %p524_p2 = pneg %p742_p0 }
  0x18   : > { %s527_s21 = scalar_lea.hbm %s847_s0, 256  ;;  %p528_p4 = scmp.lt.u32.totalorder %s736_s6, %s847_s0 }
  0x19   : > { %p525_p3 = pnand %p524_p2, %p523_p1  ;;  %p529_p6 = scmp.lt.u32.totalorder %s527_s21, %s522_s11 }
  0x1a   : > { %p531_p10 = scmp.lt.u32.totalorder %s522_s11, %s736_s6 }
  0x1b   : > { %p526_p5 = pneg %p525_p3  ;;  %p530_p7 = por %p529_p6, %p528_p4 }
  0x1d   : > { %p532_p13 = por %p531_p10, %p530_p7 }
  0x1f   : > { %p533_p12 = pnand %p532_p13, %p526_p5 }
  0x21   : > { %536 = shalt.err (!%p533_p12)
}
  0x22   : > { %s537_s28 = scalar_lea.vmem %s738_s8, 128  ;;  %s636_s29 = smov [#allocation2]  }
  0x23   : > { %p538_p1 = scmp.ne.s32.totalorder %s738_s8, %s537_s28  ;;  %s542_s30 = sshll.u32 %s636_s29, 4  ;;  %s543_s30 = int_to_ptr.vmem [resolvable:$false] %s542_s30 }
  0x24   : > { %s544_s4 = scalar_lea.vmem %s543_s30, 256  ;;  %p545_p9 = scmp.lt.s32.totalorder %s738_s8, %s543_s30 }
  0x25   : > { %p540_p3 = pnand %p538_p1, %p524_p2  ;;  %p546_p4 = scmp.lt.s32.totalorder %s544_s4, %s537_s28 }
  0x27   : > { %p541_p11 = pneg %p540_p3  ;;  %p547_p6 = por %p546_p4, %p545_p9 }
  0x29   : > { %p548_p7 = pnand %p547_p6, %p541_p11 }
  0x2b   : > { %551 = shalt.err (!%p548_p7)
}
  0x2c   : > { %s637_s5 = smov 128   ;;  %s638_s7 = smov 64  }
  0x2d   : > { %s639_s11 = smov 4   ;;  %p423_p12 = scmp.ge.s32.totalorder %s634_s17, 1 }
  0x2e   : > { %457 = dma.hbm_to_vmem [thread:$0]  (!%p742_p0), %s736_s6, 128, %s738_s8, %s746_s10, %s637_s5, %s638_s7, %s639_s11  }
  0x2f   : > { %p174_p2 = scmp.lt.s32.totalorder %s634_s17, 3 }
  0x31   : > { %p175_p5 = pnand %p423_p12, %p174_p2 }
  0x32   : > { %s777_s18 = sand.u32 (!%p175_p5), 1, %s618_s13  }
  0x33   : > { %178 = sbr.rel (%p175_p5) target bundleno = 297 (0x129), region = 32  ;;  %s424_s19 = sshll.u32 (!%p175_p5), %s777_s18, 3 }
  0x34   : > { %s181_s21 = scalar_lea.sflag (!%p175_p5), [#allocation3], %s777_s18  ;;  %s184_s22 = scalar_lea.vmem (!%p175_p5), [#allocation2], %s424_s19 }
  0x3a   : > { %605 = dma.done.wait (%p714_p8), %s181_s21, 128  }
  0x3b   : > { %607 = vsyncadd (%p714_p8), %s181_s21, 4294967168  ;;  %v640_v0 = vmov 0.0   ;;  %vm641_vm0 = vmmov 0   ;;  %v642_v1 = vmov 0   ;;  %v212_v2 = vld [vmem:[%s184_s22] sm:$0xf] }
  0x3c   : > { %438 = vmatprep.subr.bf16.mxu0 %v640_v0  ;;  %444 = vmatprep.subr.bf16.mxu1 %v640_v0  ;;  %vm223_vm1 = vcmask 1041408   ;;  %v427_v3 = vld [vmem:[%s184_s22 + $0x4] sm:$0xf]  ;;  %v213_v4 = vpack.c.bf16 %v212_v2, %v212_v2  ;;  %v210_v9 = vld [vmem:[%s848_s1] sm:$0xf]  ;;  %vm219_vm2 = vcmask 31744  }
  0x3d   : > { %440 = vmatprep.mubr.msk.bf16.mxu0 %vm641_vm0, %v640_v0  ;;  %446 = vmatprep.mubr.msk.bf16.mxu1 %vm641_vm0, %v640_v0  ;;  %v270_v5 = vpack.c.bf16 %v427_v3, %v427_v3  ;;  %v211_v6 = vld [vmem:[%s849_s2] sm:$0xff]  ;;  %s425_s10 = sshll.u32 %s777_s18, 4  ;;  %s431_s29 = sshll.u32 %s626_s15, 7 }
  0x3e   : > { %521 = vset.pattern.permute.xlu0 %v642_v1  ;;  %v225_v7 = vsel %vm223_vm1, %v213_v4, 0  ;;  %s206_s23 = scalar_lea.vmem [#allocation5], %s425_s10  ;;  %s798_s5 = scalar_lea.hbm %s850_s3, %s431_s29 }
  0x3f   : > { %216 = vperm.xlu0 %521, %v211_v6   ;;  %v272_v8 = vsel %vm223_vm1, %v270_v5, 0  ;;  %439 = vmatpush3.bf16.msra.mxu0 %v225_v7  ;;  %s332_s28 = sshll.u32 %s206_s23, 4  ;;  %s317_s15 = scalar_lea.sflag [#allocation4], %s777_s18  ;;  %s793_s28 = int_to_ptr.vmem [resolvable:$true] %s332_s28 }
  0x40   : > { %445 = vmatpush3.bf16.msra.mxu1 %v272_v8  ;;  %s552_s7 = scalar_lea.vmem %s793_s28, 256  ;;  %p857_p9 = scmp.ne.s32.totalorder %s854_s25, 0 }
  0x41   : > { %p553_p8 = scmp.ne.s32.totalorder %s793_s28, %s552_s7  ;;  %s643_s11 = smov [#allocation5]  }
  0x42   : > { %441 = vmatmul.mubr.msk.bf16.vlgmr.msra.gmra.mrb[0].mxu0 %vm219_vm2, %v210_v9  ;;  %s556_s19 = sshll.u32 %s643_s11, 4  ;;  %s557_s19 = int_to_ptr.vmem [resolvable:$false] %s556_s19 }
  0x43   : > { %447 = vmatmul.mubr.msk.bf16.vlgmr.msra.gmra.mrb[0].mxu1 %vm219_vm2, %v210_v9  ;;  %p554_p11 = pnand %p553_p8, %p857_p9  ;;  %s558_s21 = scalar_lea.vmem %s557_s19, 512 }
  0x44   : > { %p559_p10 = scmp.lt.s32.totalorder %s793_s28, %s557_s19  ;;  %p560_p13 = scmp.lt.s32.totalorder %s558_s21, %s552_s7 }
  0x45   : > { %p555_p0 = pneg %p554_p11 }
  0x46   : > { %p561_p1 = por %p560_p13, %p559_p10 }
  0x48   : > { %p562_p3 = pnand %p561_p1, %p555_p0 }
  0xbe   : > { %v217_v10 = vpop.permute.xlu0 %216 }
 0x115   : > { %v261_v11 = vpop.f32.mrb[0].mxu0 }
 0x116   : > { %v308_v12 = vpop.f32.mrb[0].mxu1  ;;  %v262_v13 = vadd.f32 %v261_v11, %v217_v10  ;;  %v442_v15 = vpop.f32.mrb[1].mxu0 }
 0x117   : > { %v309_v14 = vadd.f32 %v308_v12, %v217_v10  ;;  %v448_v16 = vpop.f32.mrb[1].mxu1  ;;  %v264_v17 = vpop.f32.mrb[2].mxu0 }
 0x118   : > { %v311_v18 = vpop.f32.mrb[2].mxu1  ;;  %267 = vst [vmem:[%s206_s23] sm:$0xff] %v262_v13  ;;  %v443_v19 = vpop.f32.mrb[3].mxu0 }
 0x119   : > { %429 = vst [vmem:[%s206_s23 + $0x8] sm:$0xff] %v309_v14  ;;  %v449_v20 = vpop.f32.mrb[3].mxu1 }
 0x11a   : > { %565 = shalt.err (!%p562_p3)
}
 0x11b   : > { %s566_s22 = scalar_lea.hbm %s798_s5, 256  ;;  %s570_s24 = scalar_lea.hbm %s850_s3, 512 }
 0x11c   : > { %p567_p4 = scmp.ne.s32.totalorder %s798_s5, %s566_s22  ;;  %p571_p12 = scmp.lt.u32.totalorder %s798_s5, %s850_s3 }
 0x11d   : > { %p572_p2 = scmp.lt.u32.totalorder %s570_s24, %s566_s22  ;;  %p574_p8 = scmp.lt.u32.totalorder %s566_s22, %s798_s5 }
 0x11e   : > { %p568_p6 = pnand %p567_p4, %p857_p9 }
 0x11f   : > { %p573_p5 = por %p572_p2, %p571_p12 }
 0x120   : > { %p569_p7 = pneg %p568_p6 }
 0x121   : > { %p575_p11 = por %p574_p8, %p573_p5 }
 0x123   : > { %p576_p0 = pnand %p575_p11, %p569_p7 }
 0x125   : > { %579 = shalt.err (!%p576_p0)
}
 0x126   : > { %s644_s23 = smov 128   ;;  %s645_s29 = smov 256  }
 0x127   : > { %s646_s30 = smov 8  }
 0x128   : > { %452 = dma.vmem_to_hbm [thread:$0]  (%p857_p9), %s793_s28, 256, %s798_s5, %s317_s15, %s644_s23, %s645_s29, %s646_s30  }
 0x129 PF: > { %s347_s4 = sand.u32 1, %s614_s12   ;;  %p858_p10 = scmp.ne.s32.totalorder %s855_s27, 0 }
 0x12a   : > { %p859_p13 = scmp.ge.s32.totalorder %s634_s17, 2  ;;  %s348_s7 = scalar_lea.sflag [#allocation4], %s347_s4 }
 0x12c   : > { %p459_p1 = pnand %p859_p13, %p858_p10 }
 0x12e   : > { %609 = dma.done.wait (!%p459_p1), %s348_s7, 256  }
 0x12f   : > { %611 = vsyncadd (!%p459_p1), %s348_s7, 4294967040  ;;  %s19_s17 = sadd.s32 1, %s634_s17   ;;  %s860_s12 = smov %s618_s13 }
 0x130   : > { %p16_p3 = scmp.ge.s32.totalorder %s19_s17, 4   ;;  %s861_s13 = smov %s622_s14 }
 0x131   : > { %s862_s14 = smov %s723_s26  ;;  %s863_s15 = smov %s630_s16 }
 0x132   : > { %s864_s16 = smov %s866_s20  ;;  %18 = sbr.rel (!%p16_p3) target bundleno = 6 (0x6), region = 79 }
 0x139   :  { %353 = vsyncpa [#allocation3], 1 }
 0x13a   :  { %355 = vsyncpa [#allocation3 + $0x1], 1 }
 0x13b   :  { %356 = vsyncpa [#allocation4], 1 }
 0x13c   :  { %358 = vsyncpa [#allocation4 + $0x1], 1 }

</bundles_post_ra>
